<compile_context>
chip_gen: v5e
topology: v5e:2x2
jax: 0.10.0
libtpu: 0.0.40
codegen_flags: <defaults>
</compile_context>

<pallas_src>
import functools

import jax
import jax.numpy as jnp
from jax.experimental import pallas as pl
from jax.experimental.pallas import tpu as pltpu

LN_EPS = 1e-5


def _vmem_limit_bytes():
    """Generation-aware scoped-VMEM budget (110 MiB on 128 MiB parts, ~56 MiB on v7x)."""
    try:
        cap = int(pltpu.get_tpu_info().vmem_capacity_bytes)
    except Exception:
        cap = 64 * 1024 * 1024
    return int(max(32 * 1024 * 1024, min(cap - 8 * 1024 * 1024, 110 * 1024 * 1024)))


# --------------------------- kernel 1: GroupNorm stats ---------------------------

def _gn_stats_kernel(xg_ref, mean_ref, rstd_ref, *, eps):
    xg = xg_ref[...]                                     # (G, S) f32
    inv_n = 1.0 / xg.shape[-1]
    s1 = jnp.sum(xg, axis=-1, keepdims=True)             # one pass: sum & sum-of-squares
    s2 = jnp.sum(xg * xg, axis=-1, keepdims=True)
    m = s1 * inv_n
    var = jnp.maximum(s2 * inv_n - m * m, 0.0)
    mean_ref[...] = m
    rstd_ref[...] = jax.lax.rsqrt(var + eps)


def _gn_stats(x4, num_groups, eps, vmem_limit):
    B, C, H, W = x4.shape
    S = (C // num_groups) * H * W
    xg = x4.reshape(B, num_groups, S)                    # groups are channel-contiguous
    kern = functools.partial(_gn_stats_kernel, eps=eps)
    return pl.pallas_call(
        kern,
        out_shape=(jax.ShapeDtypeStruct((B, num_groups, 1), jnp.float32),
                   jax.ShapeDtypeStruct((B, num_groups, 1), jnp.float32)),
        grid=(B,),
        in_specs=[pl.BlockSpec((None, num_groups, S), lambda b: (b, 0, 0))],
        out_specs=(pl.BlockSpec((None, num_groups, 1), lambda b: (b, 0, 0)),
                   pl.BlockSpec((None, num_groups, 1), lambda b: (b, 0, 0))),
        compiler_params=pltpu.CompilerParams(
            dimension_semantics=("parallel",), vmem_limit_bytes=vmem_limit),
    )(xg)


# ------------------------ kernel 2: GroupNorm apply + K/V ------------------------

def _gn_kv_kernel(x_ref, gns_ref, gnb_ref, wk_ref, bk_ref, wv_ref, bv_ref,
                  k_ref, v_ref):
    # GroupNorm folded to per-(batch, channel) affine; done once per row tile.
    xn = (x_ref[...] * gns_ref[...] + gnb_ref[...]).astype(jnp.bfloat16)   # (tq, C)
    # Full-width matmuls (N = C); weights have constant block index -> DMA'd once.
    k_ref[...] = (jnp.dot(xn, wk_ref[...], preferred_element_type=jnp.float32)
                  + bk_ref[...]).astype(jnp.bfloat16)
    v_ref[...] = (jnp.dot(xn, wv_ref[...], preferred_element_type=jnp.float32)
                  + bv_ref[...]).astype(jnp.bfloat16)


def _gn_kv(xt, gns, gnb, p, *, q_block, vmem_limit):
    B, T, C = xt.shape
    nq = T // q_block
    out_shape = jax.ShapeDtypeStruct((B, T, C), jnp.bfloat16)   # lane-dense '(h d)' cols

    row_spec = pl.BlockSpec((None, q_block, C), lambda b, i: (b, i, 0))
    gn_spec = pl.BlockSpec((None, 1, C), lambda b, i: (b, 0, 0))
    w_spec = pl.BlockSpec((C, C), lambda b, i: (0, 0))
    b_spec = pl.BlockSpec((1, C), lambda b, i: (0, 0))

    return pl.pallas_call(
        _gn_kv_kernel,
        out_shape=(out_shape, out_shape),
        grid=(B, nq),
        in_specs=[row_spec, gn_spec, gn_spec, w_spec, b_spec, w_spec, b_spec],
        out_specs=(row_spec, row_spec),
        compiler_params=pltpu.CompilerParams(
            dimension_semantics=("parallel", "parallel"),
            vmem_limit_bytes=vmem_limit),
    )(xt, gns, gnb, p["wk"], p["bk"], p["wv"], p["bv"])


# ------- kernel 3: Q proj + flash attention + o_proj + LayerNorm + residual -------

def _attn_out_kernel(x_ref, gns_ref, gnb_ref, wq_ref, bq_ref, k_ref, v_ref,
                     wo_ref, bo_ref, lng_ref, lnb_ref, o_ref,
                     q_sc, m_sc, l_sc, acc_sc,
                     *, num_heads, head_dim, inv_rescale):
    kj = pl.program_id(2)

    def split_heads(t2d):
        # (rows, C) -> (heads, rows, head_dim) via static lane slices (no 3-D reshape)
        return jnp.stack(
            [t2d[:, h * head_dim:(h + 1) * head_dim] for h in range(num_heads)],
            axis=0)

    @pl.when(kj == 0)
    def _init():
        # Q projection fused here: GN affine + matmul on the already-resident x tile.
        xn = (x_ref[...] * gns_ref[...] + gnb_ref[...]).astype(jnp.bfloat16)  # (tq, C)
        q = (jnp.dot(xn, wq_ref[...], preferred_element_type=jnp.float32)
             + bq_ref[...]).astype(jnp.bfloat16)          # 1/sqrt(d) folded into wq/bq
        q_sc[...] = split_heads(q)                        # (h, tq, dh) bf16
        m_sc[...] = jnp.full(m_sc.shape, -jnp.inf, dtype=m_sc.dtype)
        l_sc[...] = jnp.zeros(l_sc.shape, dtype=l_sc.dtype)
        acc_sc[...] = jnp.zeros(acc_sc.shape, dtype=acc_sc.dtype)

    k3 = split_heads(k_ref[...])                          # (h, tk, dh) bf16
    v3 = split_heads(v_ref[...])
    q3 = q_sc[...]

    # head-batched matmuls, f32 accumulation
    s = jnp.einsum("hqd,hkd->hqk", q3, k3, preferred_element_type=jnp.float32)

    m_prev = m_sc[...]
    m_new = jnp.maximum(m_prev, jnp.max(s, axis=-1, keepdims=True))
    alpha = jnp.exp(m_prev - m_new)
    p = jnp.exp(s - m_new)
    l_sc[...] = alpha * l_sc[...] + jnp.sum(p, axis=-1, keepdims=True)
    acc_sc[...] = alpha * acc_sc[...] + jnp.einsum(
        "hqk,hkd->hqd", p.astype(v3.dtype), v3, preferred_element_type=jnp.float32)
    m_sc[...] = m_new

    @pl.when(kj == pl.num_programs(2) - 1)
    def _finalize():
        # exact softmax denominator (runs once per q tile; cost negligible)
        ctx3 = acc_sc[...] / l_sc[...]                                  # (h, tq, dh) f32
        # merge '(h d)' on lanes -> single (tq, C) x (C, C) o_proj matmul
        ctx = jnp.concatenate([ctx3[h] for h in range(num_heads)],
                              axis=-1).astype(jnp.bfloat16)             # (tq, C)
        o = (jnp.dot(ctx, wo_ref[...], preferred_element_type=jnp.float32)
             + bo_ref[...])                                             # (tq, C) f32
        mu = jnp.mean(o, axis=-1, keepdims=True)
        var = jnp.mean((o - mu) ** 2, axis=-1, keepdims=True)
        o = (o - mu) * jax.lax.rsqrt(var + LN_EPS) * lng_ref[...] + lnb_ref[...]
        # residual (pre-GroupNorm x) + rescale; lane-dense (tq, C) store
        o_ref[...] = ((o + x_ref[...]) * inv_rescale).astype(o_ref.dtype)


def _attn_out(xt, gns, gnb, k, v, p, *, num_heads, head_dim,
              q_block, kv_block, inv_rescale, vmem_limit):
    B, T, C = xt.shape
    nq, nkv = T // q_block, T // kv_block
    kern = functools.partial(_attn_out_kernel, num_heads=num_heads,
                             head_dim=head_dim, inv_rescale=inv_rescale)

    return pl.pallas_call(
        kern,
        out_shape=jax.ShapeDtypeStruct((B, T, C), jnp.float32),
        grid=(B, nq, nkv),
        in_specs=[
            pl.BlockSpec((None, q_block, C), lambda b, i, j: (b, i, 0)),    # x (residual+Q)
            pl.BlockSpec((None, 1, C), lambda b, i, j: (b, 0, 0)),          # gn scale
            pl.BlockSpec((None, 1, C), lambda b, i, j: (b, 0, 0)),          # gn shift
            pl.BlockSpec((C, C), lambda b, i, j: (0, 0)),                   # wq
            pl.BlockSpec((1, C), lambda b, i, j: (0, 0)),                   # bq
            pl.BlockSpec((None, kv_block, C), lambda b, i, j: (b, j, 0)),   # k
            pl.BlockSpec((None, kv_block, C), lambda b, i, j: (b, j, 0)),   # v
            pl.BlockSpec((C, C), lambda b, i, j: (0, 0)),                   # wo
            pl.BlockSpec((1, C), lambda b, i, j: (0, 0)),                   # bo
            pl.BlockSpec((1, C), lambda b, i, j: (0, 0)),                   # ln gamma
            pl.BlockSpec((1, C), lambda b, i, j: (0, 0)),                   # ln beta
        ],
        out_specs=pl.BlockSpec((None, q_block, C), lambda b, i, j: (b, i, 0)),
        scratch_shapes=[
            pltpu.VMEM((num_heads, q_block, head_dim), jnp.bfloat16),   # q (per q tile)
            pltpu.VMEM((num_heads, q_block, 1), jnp.float32),           # m
            pltpu.VMEM((num_heads, q_block, 1), jnp.float32),           # l
            pltpu.VMEM((num_heads, q_block, head_dim), jnp.float32),    # acc
        ],
        compiler_params=pltpu.CompilerParams(
            dimension_semantics=("parallel", "parallel", "arbitrary"),
            vmem_limit_bytes=vmem_limit),
    )(xt, gns, gnb, p["wq"], p["bq"], k, v, p["wo"], p["bo"], p["ln_g"], p["ln_b"])


# --------------------------------- full forward ---------------------------------

def memory_efficient_attention(x, prepared, *, num_heads, head_dim, num_groups,
                               eps=1e-5, rescale_output_factor=1.0,
                               q_block=256, kv_block=512):
    B, C, H, W = x.shape
    T = H * W
    assert num_heads * head_dim == C
    assert C % num_groups == 0
    q_block = min(q_block, T)
    kv_block = min(kv_block, T)
    assert T % q_block == 0 and T % kv_block == 0
    # NOTE(v7x): B * (T // q_block) should be >= 2 so both TensorCores get work.

    vmem_limit = _vmem_limit_bytes()

    # TODO(synk): fold these layout transposes into the kernels (write a transposed
    # (C, tq) output tile) to save two full HBM passes, most valuable on v5e.
    xt = x.reshape(B, C, T).transpose(0, 2, 1)                     # (B, T, C)

    # GroupNorm stats folded into per-(batch, channel) scale/shift
    mean, rstd = _gn_stats(x, num_groups, eps, vmem_limit)         # (B, G, 1) each
    cg = C // num_groups
    g3 = prepared["gn_g"].reshape(1, num_groups, cg)
    b3 = prepared["gn_b"].reshape(1, num_groups, cg)
    scale = rstd * g3                                              # (B, G, cg)
    shift = b3 - mean * scale
    gns = scale.reshape(B, 1, C)
    gnb = shift.reshape(B, 1, C)

    k, v = _gn_kv(xt, gns, gnb, prepared, q_block=q_block, vmem_limit=vmem_limit)
    out_t = _attn_out(xt, gns, gnb, k, v, prepared,
                      num_heads=num_heads, head_dim=head_dim,
                      q_block=q_block, kv_block=kv_block,
                      inv_rescale=1.0 / float(rescale_output_factor),
                      vmem_limit=vmem_limit)
    return out_t.transpose(0, 2, 1).reshape(B, C, H, W)


# ------------------------------ parameter handling ------------------------------

def make_params(key, channels):
    ks = jax.random.split(key, 12)

    def lin_w(k):
        return 0.05 * jax.random.normal(k, (channels, channels), jnp.float32)

    def vec(k, base=0.0, scl=0.1):
        return base + scl * jax.random.normal(k, (channels,), jnp.float32)

    return dict(
        gn_g=vec(ks[0], 1.0), gn_b=vec(ks[1]),
        wq=lin_w(ks[2]), bq=vec(ks[3]),
        wk=lin_w(ks[4]), bk=vec(ks[5]),
        wv=lin_w(ks[6]), bv=vec(ks[7]),
        wo=lin_w(ks[8]), bo=vec(ks[9]),
        ln_g=vec(ks[10], 1.0), ln_b=vec(ks[11]),
    )


def prepare_params(p, *, num_heads, head_dim):
    """One-time folds: 1/sqrt(d) into wq/bq; bf16 cast of MXU weight operands.
    The natural (C_in, C_out) column order is already '(h d)' head-major, so no
    reordering is needed for the lane-dense (T, C) q/k/v layout."""
    C = p["wq"].shape[0]
    scale = float(head_dim) ** -0.5
    return dict(
        gn_g=p["gn_g"], gn_b=p["gn_b"],
        wq=(p["wq"] * scale).astype(jnp.bfloat16), bq=(p["bq"] * scale).reshape(1, C),
        wk=p["wk"].astype(jnp.bfloat16), bk=p["bk"].reshape(1, C),
        wv=p["wv"].astype(jnp.bfloat16), bv=p["bv"].reshape(1, C),
        wo=p["wo"].astype(jnp.bfloat16), bo=p["bo"].reshape(1, C),
        ln_g=p["ln_g"].reshape(1, C), ln_b=p["ln_b"].reshape(1, C),
    )


# ------------------------------ pure-JAX reference ------------------------------

def reference_forward(x, p, *, num_heads, head_dim, num_groups, eps,
                      rescale_output_factor):
    B, C, H, W = x.shape
    T = H * W
    cg = C // num_groups
    xg = x.reshape(B, num_groups, cg * H * W)
    mu = xg.mean(-1, keepdims=True)
    var = ((xg - mu) ** 2).mean(-1, keepdims=True)
    xn = ((xg - mu) / jnp.sqrt(var + eps)).reshape(B, C, H, W)
    xn = xn * p["gn_g"].reshape(1, C, 1, 1) + p["gn_b"].reshape(1, C, 1, 1)

    h = xn.reshape(B, C, T).transpose(0, 2, 1)                      # (B, T, C)
    q = h @ p["wq"] + p["bq"]
    k = h @ p["wk"] + p["bk"]
    v = h @ p["wv"] + p["bv"]

    def split(t):
        return t.reshape(B, T, num_heads, head_dim).transpose(0, 2, 1, 3)

    qh = split(q) / jnp.sqrt(jnp.float32(head_dim))
    kh, vh = split(k), split(v)
    s = jnp.einsum("bhqd,bhkd->bhqk", qh, kh)
    w = jax.nn.softmax(s, axis=-1)
    o = jnp.einsum("bhqk,bhkd->bhqd", w, vh)
    o = o.transpose(0, 2, 1, 3).reshape(B, T, C)
    o = o @ p["wo"] + p["bo"]
    mu = o.mean(-1, keepdims=True)
    var = ((o - mu) ** 2).mean(-1, keepdims=True)
    o = (o - mu) / jnp.sqrt(var + LN_EPS) * p["ln_g"] + p["ln_b"]
    o = o.transpose(0, 2, 1).reshape(B, C, H, W)
    return (o + x) / rescale_output_factor


# ------------------------------------- main -------------------------------------

if __name__ == "__main__":
    B, C, H, W = 2, 32, 16, 16        # T = 256 tokens
    NUM_HEAD_CHANNELS = 8
    NUM_GROUPS = 8
    num_heads = C // NUM_HEAD_CHANNELS          # 4
    head_dim = NUM_HEAD_CHANNELS                # 8
    RESCALE = 1.0

    key = jax.random.PRNGKey(0)
    kx, kp = jax.random.split(key)
    x = jax.random.normal(kx, (B, C, H, W), jnp.float32)

    raw_params = make_params(kp, C)
    prepared = prepare_params(raw_params, num_heads=num_heads, head_dim=head_dim)

    # 128-wide tiles at this small shape -> grid (2, 2, 2): exercises the multi-tile
    # online-softmax accumulation. Production shapes use the larger defaults.
    out = memory_efficient_attention(
        x, prepared, num_heads=num_heads, head_dim=head_dim,
        num_groups=NUM_GROUPS, eps=1e-5, rescale_output_factor=RESCALE,
        q_block=128, kv_block=128)
    out = jax.block_until_ready(out)

    ref = reference_forward(x, raw_params, num_heads=num_heads, head_dim=head_dim,
                            num_groups=NUM_GROUPS, eps=1e-5,
                            rescale_output_factor=RESCALE)

    assert out.shape == (B, C, H, W) and out.dtype == jnp.float32
    assert bool(jnp.all(jnp.isfinite(out)))
    # bf16 MXU operands -> loose tolerance vs the all-f32 reference
    assert float(jnp.max(jnp.abs(out - ref))) < 1e-1
    print("KERNEL_OK")
</pallas_src>

<mosaic_0001>
module attributes {stable_mosaic.version = 11 : i64} {
  func.func @_gn_stats_kernel(%arg0: i32, %arg1: memref<1x8x1024xf32, #tpu.memory_space<vmem>>, %arg2: memref<1x8x1xf32, #tpu.memory_space<vmem>>, %arg3: memref<1x8x1xf32, #tpu.memory_space<vmem>>) attributes {dimension_semantics = [#tpu.dimension_semantics<parallel>], iteration_bounds = array<i64: 2>, scalar_prefetch = 0 : i64, scratch_operands = 0 : i64, tpu.core_type = #tpu.core_type<tc>, window_params = [{transform_indices = @transform_0, window_bounds = array<i64: 1, 8, 1024>}, {transform_indices = @transform_1, window_bounds = array<i64: 1, 8, 1>}, {transform_indices = @transform_2, window_bounds = array<i64: 1, 8, 1>}]} {
    %c0 = arith.constant 0 : index
    %c0_0 = arith.constant 0 : index
    %c0_1 = arith.constant 0 : index
    %0 = vector.load %arg1[%c0, %c0_0, %c0_1] : memref<1x8x1024xf32, #tpu.memory_space<vmem>>, vector<1x8x1024xf32>
    %1 = vector.shape_cast %0 : vector<1x8x1024xf32> to vector<8x1024xf32>
    %cst = arith.constant dense<0.000000e+00> : vector<8xf32>
    %2 = vector.multi_reduction <add>, %1, %cst [1] : vector<8x1024xf32> to vector<8xf32>
    %3 = vector.shape_cast %2 : vector<8xf32> to vector<8x1xf32>
    %4 = arith.mulf %1, %1 : vector<8x1024xf32>
    %cst_2 = arith.constant dense<0.000000e+00> : vector<8xf32>
    %5 = vector.multi_reduction <add>, %4, %cst_2 [1] : vector<8x1024xf32> to vector<8xf32>
    %6 = vector.shape_cast %5 : vector<8xf32> to vector<8x1xf32>
    %cst_3 = arith.constant 9.765625E-4 : f32
    %7 = vector.broadcast %cst_3 : f32 to vector<8x1xf32>
    %8 = arith.mulf %3, %7 : vector<8x1xf32>
    %cst_4 = arith.constant 9.765625E-4 : f32
    %9 = vector.broadcast %cst_4 : f32 to vector<8x1xf32>
    %10 = arith.mulf %6, %9 : vector<8x1xf32>
    %11 = arith.mulf %8, %8 : vector<8x1xf32>
    %12 = arith.subf %10, %11 : vector<8x1xf32>
    %cst_5 = arith.constant 0.000000e+00 : f32
    %13 = vector.broadcast %cst_5 : f32 to vector<8x1xf32>
    %14 = arith.maximumf %12, %13 : vector<8x1xf32>
    %c0_6 = arith.constant 0 : index
    %c0_7 = arith.constant 0 : index
    %c0_8 = arith.constant 0 : index
    %15 = vector.load %arg2[%c0_6, %c0_7, %c0_8] : memref<1x8x1xf32, #tpu.memory_space<vmem>>, vector<1x8x1xf32>
    %16 = vector.shape_cast %15 : vector<1x8x1xf32> to vector<8x1xf32>
    %17 = vector.shape_cast %8 : vector<8x1xf32> to vector<1x8x1xf32>
    tpu.vector_store %arg2[%c0_6, %c0_7, %c0_8], %17 {strides = array<i32>} : memref<1x8x1xf32, #tpu.memory_space<vmem>>, vector<1x8x1xf32>,
    %cst_9 = arith.constant 9.99999974E-6 : f32
    %18 = vector.broadcast %cst_9 : f32 to vector<8x1xf32>
    %19 = arith.addf %14, %18 : vector<8x1xf32>
    %20 = math.rsqrt %19 : vector<8x1xf32>
    %c0_10 = arith.constant 0 : index
    %c0_11 = arith.constant 0 : index
    %c0_12 = arith.constant 0 : index
    %21 = vector.load %arg3[%c0_10, %c0_11, %c0_12] : memref<1x8x1xf32, #tpu.memory_space<vmem>>, vector<1x8x1xf32>
    %22 = vector.shape_cast %21 : vector<1x8x1xf32> to vector<8x1xf32>
    %23 = vector.shape_cast %20 : vector<8x1xf32> to vector<1x8x1xf32>
    tpu.vector_store %arg3[%c0_10, %c0_11, %c0_12], %23 {strides = array<i32>} : memref<1x8x1xf32, #tpu.memory_space<vmem>>, vector<1x8x1xf32>,
    return
  }
  func.func @transform_0(%arg0: i32) -> (i32, i32, i32) {
    %c0_i32 = arith.constant 0 : i32
    %c0_i32_0 = arith.constant 0 : i32
    %c0_i32_1 = arith.constant 0 : i32
    return %arg0, %c0_i32, %c0_i32_0 : i32, i32, i32
  }
  func.func @transform_1(%arg0: i32) -> (i32, i32, i32) {
    %c0_i32 = arith.constant 0 : i32
    %c0_i32_0 = arith.constant 0 : i32
    %c0_i32_1 = arith.constant 0 : i32
    return %arg0, %c0_i32, %c0_i32_0 : i32, i32, i32
  }
  func.func @transform_2(%arg0: i32) -> (i32, i32, i32) {
    %c0_i32 = arith.constant 0 : i32
    %c0_i32_0 = arith.constant 0 : i32
    %c0_i32_1 = arith.constant 0 : i32
    return %arg0, %c0_i32, %c0_i32_0 : i32, i32, i32
  }
}

</mosaic_0001>

<bundles_post_ra>
// kernel: tpu_custom_call.1
= control target key start
LH: loop header
LB: loop body
LE: loop exit
PB: predicated region body
PF: predicated region fallthrough
CT: control target
= control target key end

     0   :  { %8 = vsyncpa [#allocation3], 0  ;;  %s556_s0 = inlined_call_operand.hbm [shape: f32[2,8,1024], index: 0, kind: input, shape index: {}]   ;;  %s557_s1 = inlined_call_operand.vmem [shape: f32[2,8,1], index: 1, kind: output, shape index: {0}]   ;;  %s558_s2 = inlined_call_operand.vmem [shape: f32[2,8,1], index: 2, kind: output, shape index: {1}]  }
   0x1   :  { %10 = vsyncpa [#allocation3 + $0x1], 0  ;;  %s457_s9 = smov 0   ;;  %s459_s10 = smov 0  }
   0x2   :  { %s461_s11 = smov 0   ;;  %s463_s12 = smov 0  }
   0x3 LB: > { %s476_s13 = sadd.s32 4294967295, %s440_s12   ;;  %s479_s14 = sadd.s32 1, %s440_s12   ;;  %s440_s12 = sphi %s463_s12, %s565_s12   ;;  %s436_s11 = sphi %s461_s11, %s564_s11   ;;  %s432_s10 = sphi %s459_s10, %s563_s10   ;;  %s428_s9 = sphi %s457_s9, %s562_s9  }
   0x4   : > { %s20_s15 = ssub.s32 %s440_s12, %s479_s14  ;;  %s23_s16 = sadd.s32 1, %s436_s11 }
   0x5   : > { %p21_p0 = scmp.eq.s32.totalorder %s20_s15, 0  ;;  %p30_p1 = scmp.ne.s32.totalorder %s436_s11, %s432_s10 }
   0x6   : > { %p31_p2 = scmp.eq.s32.totalorder %s440_s12, 0  ;;  %p36_p3 = scmp.ne.s32.totalorder %s432_s10, %s428_s9 }
   0x7   : > { %s489_s17 = scalar_select %p21_p0, %s436_s11, %s23_s16  }
   0x8   : > { %p491_p4 = por %p31_p2, %p30_p1  ;;  %p37_p5 = scmp.eq.s32.totalorder %s476_s13, 0 }
   0x9   : > { %p341_p6 = scmp.lt.s32.totalorder %s440_s12, 2  ;;  %s112_s20 = sand.u32 1, %s436_s11  }
   0xa   : > { %p497_p7 = por %p37_p5, %p36_p3  ;;  %s325_s21 = sshll.u32 %s112_s20, 6 }
   0xb   : > { %s334_s22 = sshll.u32 %s440_s12, 6  ;;  %s116_s26 = scalar_lea.vmem [#allocation2], %s325_s21 }
   0xc   : > { %s121_s25 = scalar_lea.hbm %s556_s0, %s334_s22  ;;  %s125_s27 = sshll.u32 %s116_s26, 4  ;;  %s126_s27 = int_to_ptr.vmem [resolvable:$true] %s125_s27 }
   0xd   : > { %s123_s28 = sshll.u32 %s121_s25, 4  ;;  %p508_p8 = pnand %p341_p6, %p491_p4  ;;  %s124_s28 = int_to_ptr.hbm [resolvable:$true] %s123_s28 }
   0xe   : > { %p328_p9 = scmp.ge.s32.totalorder %s440_s12, 1  ;;  %p130_p10 = scmp.lt.s32.totalorder %s440_s12, 3 }
   0xf   : > { %s113_s30 = scalar_lea.sflag [#allocation3], %s112_s20  ;;  %s376_s3 = sshra.s32 %s124_s28, 4  ;;  %s377_s3 = int_to_ptr.hbm [resolvable:$true] %s376_s3 }
  0x10   : > { %s378_s4 = scalar_lea.hbm %s377_s3, 64  ;;  %p380_p12 = pneg %p508_p8 }
  0x11   : > { %p379_p11 = scmp.ne.s32.totalorder %s377_s3, %s378_s4  ;;  %s383_s7 = scalar_lea.hbm %s556_s0, 128 }
  0x12   : > { %p384_p1 = scmp.lt.s32.totalorder %s377_s3, %s556_s0  ;;  %p385_p2 = scmp.lt.s32.totalorder %s383_s7, %s378_s4 }
  0x13   : > { %p381_p13 = pnand %p380_p12, %p379_p11 }
  0x14   : > { %p386_p3 = por %p385_p2, %p384_p1 }
  0x15   : > { %p382_p0 = pneg %p381_p13 }
  0x17   : > { %p387_p4 = pnand %p386_p3, %p382_p0 }
  0x19   : > { %390 = shalt.err (!%p387_p4)
}
  0x1a   : > { %340 = dma.hbm_to_vmem [thread:$0]  (!%p508_p8), %s124_s28, 1024, %s126_s27, %s113_s30  }
  0x1b   : > { %p131_p5 = pnand %p328_p9, %p130_p10 }
  0x1c   : > { %s136_s15 = sand.u32 (!%p131_p5), 1, %s432_s10  }
  0x1d   : > { %134 = sbr.rel (%p131_p5) target bundleno = 201 (0xc9), region = 24  ;;  %s329_s16 = sshll.u32 (!%p131_p5), %s136_s15, 6 }
  0x1e   : > { %s137_s18 = scalar_lea.sflag (!%p131_p5), [#allocation3], %s136_s15  ;;  %s140_s20 = scalar_lea.vmem (!%p131_p5), [#allocation2], %s329_s16 }
  0x22   : > { %423 = dma.done.wait (%p497_p7), %s137_s18, 1024  }
  0x23   : > { %425 = vsyncadd (%p497_p7), %s137_s18, 4294966272  ;;  %v173_v0 = vld [vmem:[%s140_s20] sm:$0xff]  ;;  %v174_v1 = vld [vmem:[%s140_s20 + $0x8] sm:$0xff]  ;;  %p165_p6 = scmp.lt.s32.totalorder %s476_s13, 1  ;;  %vm212_vm0 = vcmask 7168  }
  0x24   : > { %v175_v2 = vld [vmem:[%s140_s20 + $0x10] sm:$0xff]  ;;  %v181_v3 = vadd.f32 %v174_v1, %v173_v0  ;;  %v190_v4 = vmul.f32 %v173_v0, %v173_v0  ;;  %v191_v5 = vmul.f32 %v174_v1, %v174_v1  ;;  %v176_v7 = vld [vmem:[%s140_s20 + $0x18] sm:$0xff]  ;;  %v177_v11 = vld [vmem:[%s140_s20 + $0x20] sm:$0xff] }
  0x25   : > { %v192_v6 = vmul.f32 %v175_v2, %v175_v2  ;;  %v193_v9 = vmul.f32 %v176_v7, %v176_v7  ;;  %v194_v13 = vmul.f32 %v177_v11, %v177_v11  ;;  %v178_v15 = vld [vmem:[%s140_s20 + $0x28] sm:$0xff]  ;;  %v179_v19 = vld [vmem:[%s140_s20 + $0x30] sm:$0xff]  ;;  %v180_v22 = vld [vmem:[%s140_s20 + $0x38] sm:$0xff]  ;;  %s567_s13 = smov (!%p165_p6, %s476_s13), 1 }
  0x26   : > { %v182_v8 = vadd.f32 %v181_v3, %v175_v2  ;;  %v198_v10 = vadd.f32 %v191_v5, %v190_v4  ;;  %v195_v17 = vmul.f32 %v178_v15, %v178_v15  ;;  %v196_v24 = vmul.f32 %v179_v19, %v179_v19  ;;  %s330_s12 = sshll.u32 %s567_s13, 3 }
  0x27   : > { %v197_v27 = vmul.f32 %v180_v22, %v180_v22  ;;  %s168_s22 = scalar_lea.vmem %s557_s1, %s330_s12  ;;  %s172_s24 = scalar_lea.vmem %s558_s2, %s330_s12 }
  0x28   : > { %v183_v12 = vadd.f32 %v182_v8, %v176_v7  ;;  %v199_v14 = vadd.f32 %v198_v10, %v192_v6 }
  0x2a   : > { %v184_v16 = vadd.f32 %v183_v12, %v177_v11  ;;  %v200_v18 = vadd.f32 %v199_v14, %v193_v9 }
  0x2c   : > { %v185_v20 = vadd.f32 %v184_v16, %v178_v15  ;;  %v201_v21 = vadd.f32 %v200_v18, %v194_v13 }
  0x2e   : > { %v186_v23 = vadd.f32 %v185_v20, %v179_v19  ;;  %v202_v25 = vadd.f32 %v201_v21, %v195_v17 }
  0x30   : > { %v187_v26 = vadd.f32 %v186_v23, %v180_v22  ;;  %v203_v28 = vadd.f32 %v202_v25, %v196_v24 }
  0x32   : > { %188 = vadd.xlane.f32.xlu0 %v187_v26  ;;  %v204_v29 = vadd.f32 %v203_v28, %v197_v27 }
  0x3a   : > { %205 = vadd.xlane.f32.xlu0 %v204_v29 }
  0xa5   : > { %v189_v30 = vpop.xlane.xlu0 %188 }
  0xa6   : > { %v207_v31 = vmul.f32 0.0009765625, %v189_v30 }
  0xa8   : > { %213 = vst.msk [vmem:[%s168_s22] sm:$0xff] %vm212_vm0, %v207_v31  ;;  %v209_v33 = vmul.f32 %v207_v31, %v207_v31 }
  0xad   : > { %v206_v32 = vpop.xlane.xlu0 %205 }
  0xae   : > { %v208_v34 = vmul.f32 0.0009765625, %v206_v32 }
  0xb0   : > { %v210_v35 = vsub.f32 %v208_v34, %v209_v33 }
  0xb2   : > { %v211_v36 = vmax.f32 %v210_v35, 0.0 }
  0xb4   : > { %v214_v37 = vadd.f32 1e-05, %v211_v36 }
  0xb6   : > { %374 = vrsqrt.f32 %v214_v37  ;;  %vm221_vm2 = vweird.f32 %v214_v37 }
  0xbc   : > { %v375_v38 = vpop.eup %374 }
  0xbd   : > { %v216_v39 = vmul.f32 %v375_v38, %v214_v37  ;;  %vm222_vm1 = vweird.f32 %v375_v38 }
  0xbe   : > { %vm223_vm3 = vmor %vm221_vm2, %vm222_vm1 }
  0xbf   : > { %v217_v40 = vmul.f32 %v375_v38, %v216_v39 }
  0xc1   : > { %v218_v41 = vmul.f32 0.5, %v217_v40 }
  0xc3   : > { %v219_v42 = vsub.f32 1.5, %v218_v41 }
  0xc5   : > { %v220_v43 = vmul.f32 %v375_v38, %v219_v42 }
  0xc7   : > { %v224_v44 = vsel %vm223_vm3, %v375_v38, %v220_v43 }
  0xc8   : > { %225 = vst.msk [vmem:[%s172_s24] sm:$0xff] %vm212_vm0, %v224_v44 }
  0xc9 PF: > { %p13_p7 = scmp.ge.s32.totalorder %s479_s14, 4   ;;  %s562_s9 = smov %s432_s10 }
  0xca   : > { %s563_s10 = smov %s436_s11  ;;  %s564_s11 = smov %s489_s17 }
  0xcb   : > { %s565_s12 = smov %s479_s14  ;;  %15 = sbr.rel (!%p13_p7) target bundleno = 3 (0x3), region = 76 }
  0xd0   :  { %259 = vsyncpa [#allocation3], 1 }
  0xd1   :  { %261 = vsyncpa [#allocation3 + $0x1], 1 }

</bundles_post_ra>
